<compile_context>
chip_gen: v6e
topology: v6e:2x2x1
jax: 0.10.0
libtpu: 0.0.40
codegen_flags: <defaults>
</compile_context>

<pallas_src>
import functools

import jax
import jax.numpy as jnp
from jax.experimental import pallas as pl
from jax.experimental.pallas import tpu as pltpu


def _gaussian_mlp_kernel(x_ref, w0_ref, b0_ref, w1_ref, b1_ref, out_ref, *,
                         n_outputs, use_tanh):
    # Hidden layer: relu(x @ W0 + b0)   -- MXU matmul + VPU elementwise.
    h = jnp.dot(x_ref[...], w0_ref[...], preferred_element_type=jnp.float32)
    h = jnp.maximum(h + b0_ref[...], 0.0)

    # Output layer: h @ W1 + b1  (N dimension padded to a 128-lane multiple).
    y = jnp.dot(h, w1_ref[...], preferred_element_type=jnp.float32)
    y = y + b1_ref[...]

    # Lane mask selecting which columns are "variance" lanes.
    lane = jax.lax.broadcasted_iota(jnp.int32, y.shape, dimension=1)
    is_var = jnp.logical_and(lane >= n_outputs, lane < 2 * n_outputs)

    # Numerically stable softplus: max(x,0) + log(1 + exp(-|x|)).
    softplus = jnp.maximum(y, 0.0) + jnp.log(1.0 + jnp.exp(-jnp.abs(y)))
    out = jnp.where(is_var, softplus, y)

    if use_tanh:
        is_mean = lane < n_outputs
        out = jnp.where(is_mean, (jnp.tanh(out) + 1.0) * 0.5, out)

    out_ref[...] = out.astype(out_ref.dtype)


def gaussian_mlp_forward(x, params, *, n_outputs, use_tanh=False, block_b=256):
    """GaussianMLP forward. Returns (mean, variance), each (B, n_outputs)."""
    w0, b0, w1, b1 = params
    B, d_in = x.shape
    H = w0.shape[1]
    two_o = 2 * n_outputs

    # ---- lane-dense output: pad N to a multiple of 128 lanes -------------
    n_pad = pl.cdiv(two_o, 128) * 128
    w1p = jnp.zeros((H, n_pad), w1.dtype).at[:, :two_o].set(w1)
    b1p = jnp.zeros((1, n_pad), b1.dtype).at[:, :two_o].set(b1)

    # ---- batch tiling ----------------------------------------------------
    if B <= block_b:
        tb, b_pad, xp = B, B, x                     # single block == full batch
    else:
        tb = block_b
        b_pad = pl.cdiv(B, tb) * tb
        xp = jnp.zeros((b_pad, d_in), x.dtype).at[:B].set(x)
    grid = (b_pad // tb,)

    kernel = functools.partial(
        _gaussian_mlp_kernel, n_outputs=n_outputs, use_tanh=use_tanh)

    out = pl.pallas_call(
        kernel,
        out_shape=jax.ShapeDtypeStruct((b_pad, n_pad), jnp.float32),
        grid=grid,
        in_specs=[
            pl.BlockSpec((tb, d_in), lambda i: (i, 0)),    # x: tiled over batch
            pl.BlockSpec((d_in, H), lambda i: (0, 0)),     # W0: VMEM-resident
            pl.BlockSpec((1, H), lambda i: (0, 0)),        # b0
            pl.BlockSpec((H, n_pad), lambda i: (0, 0)),    # W1 (lane-padded)
            pl.BlockSpec((1, n_pad), lambda i: (0, 0)),    # b1 (lane-padded)
        ],
        out_specs=pl.BlockSpec((tb, n_pad), lambda i: (i, 0)),
        compiler_params=pltpu.CompilerParams(
            dimension_semantics=("parallel",)),
    )(xp, w0, b0, w1p, b1p)

    mean = out[:B, :n_outputs]
    var = out[:B, n_outputs:two_o]
    return mean, var


def init_params(key, inputs, hidden, outputs):
    """Deterministic init matching PyTorch nn.Linear shapes (pre-transposed)."""
    k0, k1, k2, k3 = jax.random.split(key, 4)
    bound0 = 1.0 / jnp.sqrt(inputs)
    bound1 = 1.0 / jnp.sqrt(hidden)
    w0 = jax.random.uniform(k0, (inputs, hidden), jnp.float32, -bound0, bound0)
    b0 = jax.random.uniform(k1, (1, hidden), jnp.float32, -bound0, bound0)
    w1 = jax.random.uniform(k2, (hidden, 2 * outputs), jnp.float32, -bound1, bound1)
    b1 = jax.random.uniform(k3, (1, 2 * outputs), jnp.float32, -bound1, bound1)
    return w0, b0, w1, b1


def reference_forward(x, params, n_outputs, use_tanh=False):
    """Pure-JAX reference for correctness check."""
    w0, b0, w1, b1 = params
    h = jnp.maximum(x @ w0 + b0, 0.0)
    y = h @ w1 + b1
    mean, var_raw = y[:, :n_outputs], y[:, n_outputs:]
    var = jax.nn.softplus(var_raw)
    if use_tanh:
        mean = (jnp.tanh(mean) + 1.0) / 2.0
    return mean, var


if __name__ == "__main__":
    # GaussianMLP(inputs=4, outputs=2, hidden_layers=[32], activation='relu')
    INPUTS, HIDDEN, OUTPUTS = 4, 32, 2

    key = jax.random.PRNGKey(0)
    kx, kp = jax.random.split(key)
    params = init_params(kp, INPUTS, HIDDEN, OUTPUTS)

    # Case 1: batch large enough to exercise the batch grid (2 grid steps).
    B1 = 256
    x1 = jax.random.normal(kx, (B1, INPUTS), dtype=jnp.float32)
    mean1, var1 = gaussian_mlp_forward(
        x1, params, n_outputs=OUTPUTS, use_tanh=False, block_b=128)
    mean1, var1 = jax.block_until_ready((mean1, var1))
    ref_mean1, ref_var1 = reference_forward(x1, params, OUTPUTS, use_tanh=False)
    assert mean1.shape == (B1, OUTPUTS) and var1.shape == (B1, OUTPUTS)
    assert jnp.allclose(mean1, ref_mean1, atol=1e-5, rtol=1e-5)
    assert jnp.allclose(var1, ref_var1, atol=1e-5, rtol=1e-5)
    assert bool(jnp.all(var1 >= 0.0))  # softplus output is non-negative

    # Case 2: tiny batch (single block), tanh head enabled.
    B2 = 8
    x2 = jax.random.normal(jax.random.PRNGKey(1), (B2, INPUTS), dtype=jnp.float32)
    mean2, var2 = gaussian_mlp_forward(
        x2, params, n_outputs=OUTPUTS, use_tanh=True)
    mean2, var2 = jax.block_until_ready((mean2, var2))
    ref_mean2, ref_var2 = reference_forward(x2, params, OUTPUTS, use_tanh=True)
    assert jnp.allclose(mean2, ref_mean2, atol=1e-5, rtol=1e-5)
    assert jnp.allclose(var2, ref_var2, atol=1e-5, rtol=1e-5)
    assert bool(jnp.all(var2 >= 0.0))

    print("KERNEL_OK")
</pallas_src>

<mosaic_0001>
module attributes {stable_mosaic.version = 11 : i64} {
  func.func @_gaussian_mlp_kernel(%arg0: i32, %arg1: memref<128x4xf32, #tpu.memory_space<vmem>>, %arg2: memref<4x32xf32, #tpu.memory_space<vmem>>, %arg3: memref<1x32xf32, #tpu.memory_space<vmem>>, %arg4: memref<32x128xf32, #tpu.memory_space<vmem>>, %arg5: memref<1x128xf32, #tpu.memory_space<vmem>>, %arg6: memref<128x128xf32, #tpu.memory_space<vmem>>) attributes {dimension_semantics = [#tpu.dimension_semantics<parallel>], iteration_bounds = array<i64: 2>, scalar_prefetch = 0 : i64, scratch_operands = 0 : i64, tpu.core_type = #tpu.core_type<tc>, window_params = [{transform_indices = @transform_0, window_bounds = array<i64: 128, 4>}, {pipeline_mode = #tpu.pipeline_mode<synchronous>, transform_indices = @transform_1, window_bounds = array<i64: 4, 32>}, {pipeline_mode = #tpu.pipeline_mode<synchronous>, transform_indices = @transform_2, window_bounds = array<i64: 1, 32>}, {pipeline_mode = #tpu.pipeline_mode<synchronous>, transform_indices = @transform_3, window_bounds = array<i64: 32, 128>}, {pipeline_mode = #tpu.pipeline_mode<synchronous>, transform_indices = @transform_4, window_bounds = array<i64: 1, 128>}, {transform_indices = @transform_5, window_bounds = array<i64: 128, 128>}]} {
    %c0 = arith.constant 0 : index
    %c0_0 = arith.constant 0 : index
    %0 = vector.load %arg1[%c0, %c0_0] : memref<128x4xf32, #tpu.memory_space<vmem>>, vector<128x4xf32>
    %c0_1 = arith.constant 0 : index
    %c0_2 = arith.constant 0 : index
    %1 = vector.load %arg2[%c0_1, %c0_2] : memref<4x32xf32, #tpu.memory_space<vmem>>, vector<4x32xf32>
    %cst = arith.constant dense<0.000000e+00> : vector<128x32xf32>
    %2 = tpu.matmul %0, %1, %cst {dimension_numbers = #tpu.dot_dimension_numbers<[1], [0], [0], [1], [0, 0, 1, 1], [], []>} : vector<128x4xf32>, vector<4x32xf32>, vector<128x32xf32> -> vector<128x32xf32>
    %c0_3 = arith.constant 0 : index
    %c0_4 = arith.constant 0 : index
    %3 = vector.load %arg3[%c0_3, %c0_4] : memref<1x32xf32, #tpu.memory_space<vmem>>, vector<1x32xf32>
    %4 = vector.broadcast %3 : vector<1x32xf32> to vector<128x32xf32>
    %5 = arith.addf %2, %4 : vector<128x32xf32>
    %cst_5 = arith.constant 0.000000e+00 : f32
    %6 = vector.broadcast %cst_5 : f32 to vector<128x32xf32>
    %7 = arith.maximumf %5, %6 : vector<128x32xf32>
    %c0_6 = arith.constant 0 : index
    %c0_7 = arith.constant 0 : index
    %8 = vector.load %arg4[%c0_6, %c0_7] : memref<32x128xf32, #tpu.memory_space<vmem>>, vector<32x128xf32>
    %cst_8 = arith.constant dense<0.000000e+00> : vector<128x128xf32>
    %9 = tpu.matmul %7, %8, %cst_8 {dimension_numbers = #tpu.dot_dimension_numbers<[1], [0], [0], [1], [0, 0, 1, 1], [], []>} : vector<128x32xf32>, vector<32x128xf32>, vector<128x128xf32> -> vector<128x128xf32>
    %c0_9 = arith.constant 0 : index
    %c0_10 = arith.constant 0 : index
    %10 = vector.load %arg5[%c0_9, %c0_10] : memref<1x128xf32, #tpu.memory_space<vmem>>, vector<1x128xf32>
    %11 = vector.broadcast %10 : vector<1x128xf32> to vector<128x128xf32>
    %12 = arith.addf %9, %11 : vector<128x128xf32>
    %13 = tpu.iota {dimensions = array<i32: 1>} : vector<128x128xi32>
    %c2_i32 = arith.constant 2 : i32
    %14 = vector.broadcast %c2_i32 : i32 to vector<128x128xi32>
    %15 = arith.cmpi sge, %13, %14 : vector<128x128xi32>
    %c4_i32 = arith.constant 4 : i32
    %16 = vector.broadcast %c4_i32 : i32 to vector<128x128xi32>
    %17 = arith.cmpi slt, %13, %16 : vector<128x128xi32>
    %18 = arith.andi %15, %17 : vector<128x128xi1>
    %cst_11 = arith.constant 0.000000e+00 : f32
    %19 = vector.broadcast %cst_11 : f32 to vector<128x128xf32>
    %20 = arith.maximumf %12, %19 : vector<128x128xf32>
    %21 = math.absf %12 : vector<128x128xf32>
    %cst_12 = arith.constant 0.000000e+00 : f32
    %22 = vector.broadcast %cst_12 : f32 to vector<128x128xf32>
    %23 = arith.subf %22, %21 : vector<128x128xf32>
    %24 = math.exp %23 : vector<128x128xf32>
    %cst_13 = arith.constant 1.000000e+00 : f32
    %25 = vector.broadcast %cst_13 : f32 to vector<128x128xf32>
    %26 = arith.addf %25, %24 : vector<128x128xf32>
    %27 = math.log %26 : vector<128x128xf32>
    %28 = arith.addf %20, %27 : vector<128x128xf32>
    %29 = arith.select %18, %28, %12 : vector<128x128xi1>, vector<128x128xf32>
    %c0_14 = arith.constant 0 : index
    %c0_15 = arith.constant 0 : index
    %30 = vector.load %arg6[%c0_14, %c0_15] : memref<128x128xf32, #tpu.memory_space<vmem>>, vector<128x128xf32>
    tpu.vector_store %arg6[%c0_14, %c0_15], %29 {strides = array<i32>} : memref<128x128xf32, #tpu.memory_space<vmem>>, vector<128x128xf32>,
    return
  }
  func.func @transform_0(%arg0: i32) -> (i32, i32) {
    %c0_i32 = arith.constant 0 : i32
    %c0_i32_0 = arith.constant 0 : i32
    return %arg0, %c0_i32 : i32, i32
  }
  func.func @transform_1(%arg0: i32) -> (i32, i32) {
    %c0_i32 = arith.constant 0 : i32
    %c0_i32_0 = arith.constant 0 : i32
    %c0_i32_1 = arith.constant 0 : i32
    return %c0_i32, %c0_i32_0 : i32, i32
  }
  func.func @transform_2(%arg0: i32) -> (i32, i32) {
    %c0_i32 = arith.constant 0 : i32
    %c0_i32_0 = arith.constant 0 : i32
    %c0_i32_1 = arith.constant 0 : i32
    return %c0_i32, %c0_i32_0 : i32, i32
  }
  func.func @transform_3(%arg0: i32) -> (i32, i32) {
    %c0_i32 = arith.constant 0 : i32
    %c0_i32_0 = arith.constant 0 : i32
    %c0_i32_1 = arith.constant 0 : i32
    return %c0_i32, %c0_i32_0 : i32, i32
  }
  func.func @transform_4(%arg0: i32) -> (i32, i32) {
    %c0_i32 = arith.constant 0 : i32
    %c0_i32_0 = arith.constant 0 : i32
    %c0_i32_1 = arith.constant 0 : i32
    return %c0_i32, %c0_i32_0 : i32, i32
  }
  func.func @transform_5(%arg0: i32) -> (i32, i32) {
    %c0_i32 = arith.constant 0 : i32
    %c0_i32_0 = arith.constant 0 : i32
    return %arg0, %c0_i32 : i32, i32
  }
}

</mosaic_0001>

<bundles_post_ra>
// kernel: tpu_custom_call.1
= control target key start
LH: loop header
LB: loop body
LE: loop exit
PB: predicated region body
PF: predicated region fallthrough
CT: control target
= control target key end

     0   :  { %10 = vsyncpa [#allocation3], 0  ;;  %s1598_s0 = inlined_call_operand.vmem [shape: f32[256,4], index: 0, kind: input, shape index: {}]   ;;  %s1599_s1 = inlined_call_operand.vmem [shape: f32[4,32], index: 1, kind: input, shape index: {}]   ;;  %s1600_s2 = inlined_call_operand.vmem [shape: f32[1,32], index: 2, kind: input, shape index: {}]   ;;  %s1601_s3 = inlined_call_operand.vmem [shape: f32[32,128], index: 3, kind: input, shape index: {}]   ;;  %s1602_s4 = inlined_call_operand.vmem [shape: f32[1,128], index: 4, kind: input, shape index: {}]   ;;  %s1603_s5 = inlined_call_operand.hbm [shape: f32[256,128], index: 5, kind: output, shape index: {}]  }
   0x1   :  { %12 = vsyncpa [#allocation3 + $0x1], 0  ;;  %s1269_s18 = smov 0   ;;  %s1271_s19 = smov 0  }
   0x2   :  { %s1273_s20 = smov 0   ;;  %s1275_s21 = smov 0  }
   0x3 LB: > { %s1290_s22 = sadd.s32 4294967295, %s1234_s21   ;;  %s926_s23 = sadd.s32 4294967294, %s1234_s21   ;;  %s1234_s21 = sphi %s1275_s21, %s1611_s21   ;;  %s1230_s20 = sphi %s1273_s20, %s1610_s20   ;;  %s1226_s19 = sphi %s1271_s19, %s1609_s19   ;;  %s1222_s18 = sphi %s1269_s18, %s1608_s18  }
   0x4   : > { %s1294_s24 = sadd.s32 1, %s1234_s21   ;;  %s135_s25 = sadd.s32 1, %s1230_s20 }
   0x5   : > { %s132_s26 = ssub.s32 %s1234_s21, %s1294_s24  ;;  %p145_p0 = scmp.ne.s32.totalorder %s1230_s20, %s1226_s19 }
   0x6   : > { %p133_p1 = scmp.eq.s32.totalorder %s132_s26, 0  ;;  %p146_p2 = scmp.eq.s32.totalorder %s1290_s22, 1 }
   0x7   : > { %p151_p3 = scmp.ne.s32.totalorder %s1226_s19, %s1222_s18  ;;  %p152_p4 = scmp.eq.s32.totalorder %s926_s23, 1 }
   0x8   : > { %s1305_s27 = scalar_select %p133_p1, %s1230_s20, %s135_s25  }
   0x9   : > { %p1307_p5 = por %p146_p2, %p145_p0  ;;  %p1311_p6 = por %p152_p4, %p151_p3 }
   0xa   : > { %p929_p7 = scmp.ge.s32.totalorder %s1234_s21, 1  ;;  %p191_p8 = scmp.lt.s32.totalorder %s1234_s21, 3 }
   0xc   : > { %p192_p9 = pnand %p929_p7, %p191_p8 }
   0xd   : > { %s931_s7 = sshll.u32 (!%p192_p9), %s1290_s22, 4  ;;  %s1236_s17 = smov (!%p192_p9), [#allocation2]  }
   0xe   : > { %195 = sbr.rel (%p192_p9) target bundleno = 506 (0x1fa), region = 40  ;;  %p220_p10 = scmp.lt.s32.totalorder (!%p192_p9), %s931_s7, 31 }
   0xf   : > { %s1178_s23 = sshll.u32 (!%p192_p9), %s1236_s17, 4  ;;  %s1179_s23 = int_to_ptr.vmem [resolvable:$false] %s1178_s23 }
  0x10   : > { %s1180_s25 = scalar_lea.vmem (!%p192_p9), %s1179_s23, 4096 }
  0x13   : > { %v242_v0 = vld [vmem:[%s1599_s1] sm:$0xf]  ;;  %vm299_vm0 = vcmask 1043456   ;;  %s1613_s7 = smov (!%p220_p10, %s931_s7), 31  ;;  %vm250_vm1 = vcmask 31744   ;;  %v467_v17 = vld [vmem:[%s1601_s3 + $0x18] sm:$0xff] }
  0x14   : > { %1011 = vmatprep.subr.msk.mxu0 %vm299_vm0, %v242_v0  ;;  %s932_s8 = sshll.u32 %s1613_s7, 3  ;;  %1037 = vmatprep.subr.mxu1 %v467_v17  ;;  %v466_v18 = vld [vmem:[%s1601_s3 + $0x10] sm:$0xff]  ;;  %v465_v19 = vld [vmem:[%s1601_s3 + $0x8] sm:$0xff]  ;;  %v464_v20 = vld [vmem:[%s1601_s3] sm:$0xff]  ;;  %vm475_vm2 = vcmask 261120  }
  0x15   : > { %1012 = vmatpush3.msk.msra.mxu0 %vm299_vm0, %v242_v0  ;;  %s1324_s11 = scalar_lea.vmem %s1598_s0, %s932_s8  ;;  %1038 = vmatpush3.msra.mxu1 %v467_v17  ;;  %v933_v21 = vld [vmem:[%s1600_s2] ss:$0 sm:$0xff]  ;;  %s216_s8 = sand.u32 1, %s1226_s19  }
  0x16   : > { %v226_v1 = vld [vmem:[%s1324_s11] sm:$0xff]  ;;  %v227_v2 = vld [vmem:[%s1324_s11 + $0x8] sm:$0xff]  ;;  %v228_v3 = vld [vmem:[%s1324_s11 + $0x10] sm:$0xff]  ;;  %1039 = vmatprep.subr.mxu1 %v466_v18  ;;  %s930_s9 = sshll.u32 %s216_s8, 7 }
  0x17   : > { %1013 = vmatprep.mubr.msk.f32.mxu0 %vm250_vm1, %v226_v1  ;;  %v229_v4 = vld [vmem:[%s1324_s11 + $0x18] sm:$0xff]  ;;  %v230_v5 = vld [vmem:[%s1324_s11 + $0x20] sm:$0xff]  ;;  %v231_v6 = vld [vmem:[%s1324_s11 + $0x28] sm:$0xff]  ;;  %1040 = vmatpush3.msra.mxu1 %v466_v18  ;;  %s1471_s10 = scalar_lea.vmem [#allocation2], %s930_s9 }
  0x18   : > { %1014 = vmatmul.mubr.msk.f32.vlgmr.msra.gmra.mxu0 %vm250_vm1, %v227_v2  ;;  %v232_v7 = vld [vmem:[%s1324_s11 + $0x30] sm:$0xff]  ;;  %v233_v8 = vld [vmem:[%s1324_s11 + $0x38] sm:$0xff]  ;;  %v234_v9 = vld [vmem:[%s1324_s11 + $0x40] sm:$0xff]  ;;  %1041 = vmatprep.subr.mxu1 %v465_v19  ;;  %s864_s12 = sshll.u32 %s1471_s10, 4  ;;  %s1546_s12 = int_to_ptr.vmem [resolvable:$true] %s864_s12 }
  0x19   : > { %1016 = vmatprep.mubr.msk.f32.mxu0 %vm250_vm1, %v228_v3  ;;  %v235_v10 = vld [vmem:[%s1324_s11 + $0x48] sm:$0xff]  ;;  %v236_v11 = vld [vmem:[%s1324_s11 + $0x50] sm:$0xff]  ;;  %v237_v12 = vld [vmem:[%s1324_s11 + $0x58] sm:$0xff]  ;;  %1042 = vmatpush3.msra.mxu1 %v465_v19  ;;  %s1174_s16 = scalar_lea.vmem %s1546_s12, 2048  ;;  %p1181_p0 = scmp.lt.s32.totalorder %s1546_s12, %s1179_s23 }
  0x1a   : > { %v238_v13 = vld [vmem:[%s1324_s11 + $0x60] sm:$0xff]  ;;  %v239_v14 = vld [vmem:[%s1324_s11 + $0x68] sm:$0xff]  ;;  %v240_v15 = vld [vmem:[%s1324_s11 + $0x70] sm:$0xff]  ;;  %1043 = vmatprep.subr.mxu1 %v464_v20  ;;  %p1175_p11 = scmp.ne.s32.totalorder %s1546_s12, %s1174_s16  ;;  %p1182_p1 = scmp.lt.s32.totalorder %s1180_s25, %s1174_s16 }
  0x1b   : > { %v241_v16 = vld [vmem:[%s1324_s11 + $0x78] sm:$0xff]  ;;  %1044 = vmatpush3.msra.mxu1 %v464_v20  ;;  %s973_s11 = sshll.u32 %s1290_s22, 11  ;;  %s1558_s22 = scalar_lea.sflag [#allocation3], %s216_s8 }
  0x1c   : > { %1017 = vmatmul.mubr.msk.f32.gmra.mxu0 %vm250_vm1, %v229_v4  ;;  %s1544_s15 = scalar_lea.hbm %s1603_s5, %s973_s11  ;;  %p1176_p12 = pnand %p1175_p11, %p1307_p5 }
  0x1d   : > { %1019 = vmatprep.mubr.msk.f32.mxu0 %vm250_vm1, %v230_v5  ;;  %p1183_p2 = por %p1182_p1, %p1181_p0 }
  0x1e   : > { %p1177_p13 = pneg %p1176_p12 }
  0x20   : > { %1020 = vmatmul.mubr.msk.f32.gmra.mxu0 %vm250_vm1, %v231_v6  ;;  %v1392_v6 = vld [vmem:[%s1602_s4] ss:$0 sm:$0xff]  ;;  %p1184_p3 = pnand %p1183_p2, %p1177_p13 }
  0x21   : > { %1022 = vmatprep.mubr.msk.f32.mxu0 %vm250_vm1, %v232_v7 }
  0x24   : > { %1023 = vmatmul.mubr.msk.f32.gmra.mxu0 %vm250_vm1, %v233_v8 }
  0x25   : > { %1025 = vmatprep.mubr.msk.f32.mxu0 %vm250_vm1, %v234_v9 }
  0x28   : > { %1026 = vmatmul.mubr.msk.f32.gmra.mxu0 %vm250_vm1, %v235_v10 }
  0x29   : > { %1028 = vmatprep.mubr.msk.f32.mxu0 %vm250_vm1, %v236_v11 }
  0x2c   : > { %1029 = vmatmul.mubr.msk.f32.gmra.mxu0 %vm250_vm1, %v237_v12 }
  0x2d   : > { %1031 = vmatprep.mubr.msk.f32.mxu0 %vm250_vm1, %v238_v13 }
  0x30   : > { %1032 = vmatmul.mubr.msk.f32.gmra.mxu0 %vm250_vm1, %v239_v14 }
  0x31   : > { %1034 = vmatprep.mubr.msk.f32.mxu0 %vm250_vm1, %v240_v15 }
  0x34   : > { %1035 = vmatmul.mubr.msk.f32.gmra.mxu0 %vm250_vm1, %v241_v16 }
  0xd8   : > { %v1015_v22 = vpop.f32.mrf.mxu0 }
  0xd9   : > { %v375_v23 = vadd.f32 %v1015_v22, %v933_v21 }
  0xda   : > { %v369_v24 = vpop.f32.mrf.mxu0 }
  0xdb   : > { %v370_v25 = vadd.f32 %v933_v21, %v369_v24  ;;  %v449_v28 = vmax.f32 %v375_v23, 0.0 }
  0xdc   : > { %v1018_v26 = vpop.f32.mrf.mxu0 }
  0xdd   : > { %v448_v27 = vmax.f32 %v370_v25, 0.0  ;;  %v385_v29 = vadd.f32 %v1018_v26, %v933_v21 }
  0xde   : > { %v379_v30 = vpop.f32.mrf.mxu0 }
  0xdf   : > { %v380_v31 = vadd.f32 %v933_v21, %v379_v30  ;;  %1045 = vmatprep.mubr.msk.f32.mxu1 %vm475_vm2, %v448_v27  ;;  %v451_v34 = vmax.f32 %v385_v29, 0.0 }
  0xe0   : > { %v1021_v32 = vpop.f32.mrf.mxu0  ;;  %1046 = vmatmul.mubr.msk.f32.vlgmr.msra.gmra.mxu1 %vm475_vm2, %v449_v28 }
  0xe1   : > { %v450_v33 = vmax.f32 %v380_v31, 0.0  ;;  %v395_v35 = vadd.f32 %v1021_v32, %v933_v21 }
  0xe2   : > { %v389_v36 = vpop.f32.mrf.mxu0 }
  0xe3   : > { %v390_v37 = vadd.f32 %v933_v21, %v389_v36  ;;  %1048 = vmatprep.mubr.msk.f32.mxu1 %vm475_vm2, %v450_v33  ;;  %v453_v40 = vmax.f32 %v395_v35, 0.0 }
  0xe4   : > { %v1024_v38 = vpop.f32.mrf.mxu0  ;;  %1049 = vmatmul.mubr.msk.f32.gmra.mxu1 %vm475_vm2, %v451_v34 }
  0xe5   : > { %v452_v39 = vmax.f32 %v390_v37, 0.0  ;;  %v405_v41 = vadd.f32 %v1024_v38, %v933_v21 }
  0xe6   : > { %v399_v42 = vpop.f32.mrf.mxu0 }
  0xe7   : > { %v400_v43 = vadd.f32 %v933_v21, %v399_v42  ;;  %1051 = vmatprep.mubr.msk.f32.mxu1 %vm475_vm2, %v452_v39  ;;  %v455_v46 = vmax.f32 %v405_v41, 0.0 }
  0xe8   : > { %v1027_v44 = vpop.f32.mrf.mxu0  ;;  %1052 = vmatmul.mubr.msk.f32.gmra.mxu1 %vm475_vm2, %v453_v40 }
  0xe9   : > { %v454_v45 = vmax.f32 %v400_v43, 0.0  ;;  %v415_v47 = vadd.f32 %v1027_v44, %v933_v21 }
  0xea   : > { %v409_v48 = vpop.f32.mrf.mxu0 }
  0xeb   : > { %v410_v49 = vadd.f32 %v933_v21, %v409_v48  ;;  %1054 = vmatprep.mubr.msk.f32.mxu1 %vm475_vm2, %v454_v45  ;;  %v457_v52 = vmax.f32 %v415_v47, 0.0 }
  0xec   : > { %v1030_v50 = vpop.f32.mrf.mxu0  ;;  %1055 = vmatmul.mubr.msk.f32.gmra.mxu1 %vm475_vm2, %v455_v46 }
  0xed   : > { %v456_v51 = vmax.f32 %v410_v49, 0.0  ;;  %v425_v53 = vadd.f32 %v1030_v50, %v933_v21 }
  0xee   : > { %v419_v54 = vpop.f32.mrf.mxu0 }
  0xef   : > { %v420_v55 = vadd.f32 %v933_v21, %v419_v54  ;;  %1057 = vmatprep.mubr.msk.f32.mxu1 %vm475_vm2, %v456_v51  ;;  %v459_v58 = vmax.f32 %v425_v53, 0.0 }
  0xf0   : > { %v1033_v56 = vpop.f32.mrf.mxu0  ;;  %1058 = vmatmul.mubr.msk.f32.gmra.mxu1 %vm475_vm2, %v457_v52 }
  0xf1   : > { %v458_v57 = vmax.f32 %v420_v55, 0.0  ;;  %v435_v59 = vadd.f32 %v1033_v56, %v933_v21 }
  0xf2   : > { %v429_v60 = vpop.f32.mrf.mxu0 }
  0xf3   : > { %v430_v61 = vadd.f32 %v933_v21, %v429_v60  ;;  %1060 = vmatprep.mubr.msk.f32.mxu1 %vm475_vm2, %v458_v57  ;;  %v461_v0 = vmax.f32 %v435_v59, 0.0 }
  0xf4   : > { %v1036_v62 = vpop.f32.mrf.mxu0  ;;  %1061 = vmatmul.mubr.msk.f32.gmra.mxu1 %vm475_vm2, %v459_v58 }
  0xf5   : > { %v460_v63 = vmax.f32 %v430_v61, 0.0  ;;  %v445_v1 = vadd.f32 %v1036_v62, %v933_v21 }
  0xf6   : > { %v439_v2 = vpop.f32.mrf.mxu0 }
  0xf7   : > { %v440_v3 = vadd.f32 %v933_v21, %v439_v2  ;;  %1063 = vmatprep.mubr.msk.f32.mxu1 %vm475_vm2, %v460_v63  ;;  %v463_v5 = vmax.f32 %v445_v1, 0.0 }
  0xf8   : > { %1064 = vmatmul.mubr.msk.f32.gmra.mxu1 %vm475_vm2, %v461_v0 }
  0xf9   : > { %v462_v4 = vmax.f32 %v440_v3, 0.0 }
  0xfb   : > { %1066 = vmatprep.mubr.msk.f32.mxu1 %vm475_vm2, %v462_v4 }
  0xfc   : > { %1067 = vmatmul.mubr.msk.f32.gmra.mxu1 %vm475_vm2, %v463_v5 }
 0x1a0   : > { %v1047_v7 = vpop.f32.mrf.mxu1 }
 0x1a1   : > { %v1395_v8 = vadd.f32 %v1047_v7, %v1392_v6 }
 0x1a2   : > { %v590_v9 = vpop.f32.mrf.mxu1 }
 0x1a3   : > { %v691_v10 = vand.u32 2147483647, %v1395_v8  ;;  %v1399_v11 = vadd.f32 %v1392_v6, %v590_v9 }
 0x1a4   : > { %v1050_v12 = vpop.f32.mrf.mxu1 }
 0x1a5   : > { %v707_v13 = vsub.f32 0.0, %v691_v10  ;;  %v690_v14 = vand.u32 2147483647, %v1399_v11  ;;  %v1403_v15 = vadd.f32 %v1050_v12, %v1392_v6 }
 0x1a6   : > { %v600_v16 = vpop.f32.mrf.mxu1 }
 0x1a7   : > { %v724_v17 = vmul.f32 1.442695, %v707_v13  ;;  %v706_v18 = vsub.f32 0.0, %v690_v14  ;;  %v693_v19 = vand.u32 2147483647, %v1403_v15  ;;  %v1407_v20 = vadd.f32 %v1392_v6, %v600_v16 }
 0x1a8   : > { %v1053_v21 = vpop.f32.mrf.mxu1 }
 0x1a9   : > { %1110 = vpow2.f32 %v724_v17  ;;  %v722_v22 = vmul.f32 1.442695, %v706_v18  ;;  %v709_v23 = vsub.f32 0.0, %v693_v19  ;;  %v1410_v24 = vadd.f32 %v1053_v21, %v1392_v6 }
 0x1aa   : > { %v692_v25 = vand.u32 2147483647, %v1407_v20  ;;  %v610_v26 = vpop.f32.mrf.mxu1  ;;  %v669_v18 = vlaneseq }
 0x1ab   : > { %1112 = vpow2.f32 %v722_v22  ;;  %v728_v27 = vmul.f32 1.442695, %v709_v23  ;;  %v695_v28 = vand.u32 2147483647, %v1410_v24  ;;  %v1415_v30 = vadd.f32 %v1392_v6, %v610_v26 }
 0x1ac   : > { %v708_v29 = vsub.f32 0.0, %v692_v25  ;;  %v1056_v31 = vpop.f32.mrf.mxu1 }
 0x1ad   : > { %1114 = vpow2.f32 %v728_v27  ;;  %v711_v32 = vsub.f32 0.0, %v695_v28  ;;  %v1418_v33 = vadd.f32 %v1056_v31, %v1392_v6  ;;  %v694_v35 = vand.u32 2147483647, %v1415_v30 }
 0x1ae   : > { %v726_v34 = vmul.f32 1.442695, %v708_v29  ;;  %v620_v36 = vpop.f32.mrf.mxu1 }
 0x1af   : > { %v732_v37 = vmul.f32 1.442695, %v711_v32  ;;  %v697_v38 = vand.u32 2147483647, %v1418_v33  ;;  %v1423_v39 = vadd.f32 %v1392_v6, %v620_v36  ;;  %v710_v40 = vsub.f32 0.0, %v694_v35 }
 0x1b0   : > { %1116 = vpow2.f32 %v726_v34  ;;  %v1059_v41 = vpop.f32.mrf.mxu1  ;;  %v670_v36 = vand.u32 127, %v669_v18 }
 0x1b1   : > { %1118 = vpow2.f32 %v732_v37  ;;  %v713_v42 = vsub.f32 0.0, %v697_v38  ;;  %v696_v43 = vand.u32 2147483647, %v1423_v39  ;;  %v730_v44 = vmul.f32 1.442695, %v710_v40 }
 0x1b2   : > { %v1427_v45 = vadd.f32 %v1059_v41, %v1392_v6  ;;  %v630_v46 = vpop.f32.mrf.mxu1  ;;  %vm671_vm3 = vcmp.ge.s32.totalorder %v670_v36, 2  ;;  %vm672_vm4 = vcmp.lt.s32.totalorder %v670_v36, 4  ;;  %v678_v36 = vmax.f32 %v1415_v30, 0.0 }
 0x1b3   : > { %v736_v47 = vmul.f32 1.442695, %v713_v42  ;;  %v712_v48 = vsub.f32 0.0, %v696_v43  ;;  %v1430_v49 = vadd.f32 %v1392_v6, %v630_v46  ;;  %1120 = vpow2.f32 %v730_v44  ;;  %vm1462_vm5 = vmand %vm671_vm3, %vm672_vm4 }
 0x1b4   : > { %v699_v50 = vand.u32 2147483647, %v1427_v45  ;;  %v1062_v51 = vpop.f32.mrf.mxu1 }
 0x1b5   : > { %1122 = vpow2.f32 %v736_v47  ;;  %v734_v52 = vmul.f32 1.442695, %v712_v48  ;;  %v698_v53 = vand.u32 2147483647, %v1430_v49  ;;  %v1435_v56 = vadd.f32 %v1062_v51, %v1392_v6 }
 0x1b6   : > { %v1111_v54 = vpop.eup %1110  ;;  %v715_v55 = vsub.f32 0.0, %v699_v50  ;;  %v640_v57 = vpop.f32.mrf.mxu1 }
 0x1b7   : > { %v755_v58 = vadd.f32 1.0, %v1111_v54  ;;  %1124 = vpow2.f32 %v734_v52  ;;  %v714_v59 = vsub.f32 0.0, %v698_v53  ;;  %v1438_v60 = vadd.f32 %v1392_v6, %v640_v57 }
 0x1b8   : > { %v1113_v61 = vpop.eup %1112  ;;  %v740_v62 = vmul.f32 1.442695, %v715_v55  ;;  %v701_v63 = vand.u32 2147483647, %v1435_v56  ;;  %v1065_v0 = vpop.f32.mrf.mxu1  ;;  %v675_v53 = vmax.f32 %v1395_v8, 0.0 }
 0x1b9   : > { %1126 = vlog2.f32 %v755_v58  ;;  %v754_v1 = vadd.f32 1.0, %v1113_v61  ;;  %v738_v2 = vmul.f32 1.442695, %v714_v59  ;;  %v700_v5 = vand.u32 2147483647, %v1438_v60 }
 0x1ba   : > { %v1115_v3 = vpop.eup %1114  ;;  %1128 = vpow2.f32 %v740_v62  ;;  %v717_v4 = vsub.f32 0.0, %v701_v63  ;;  %v1443_v7 = vadd.f32 %v1065_v0, %v1392_v6  ;;  %v650_v9 = vpop.f32.mrf.mxu1  ;;  %v674_v62 = vmax.f32 %v1399_v11, 0.0 }
 0x1bb   : > { %1130 = vlog2.f32 %v754_v1  ;;  %v757_v10 = vadd.f32 1.0, %v1115_v3  ;;  %v1446_v12 = vadd.f32 %v1392_v6, %v650_v9  ;;  %v716_v14 = vsub.f32 0.0, %v700_v5 }
 0x1bc   : > { %1132 = vpow2.f32 %v738_v2  ;;  %v744_v13 = vmul.f32 1.442695, %v717_v4  ;;  %v1068_v16 = vpop.f32.mrf.mxu1  ;;  %v703_v19 = vand.u32 2147483647, %v1443_v7  ;;  %v677_v5 = vmax.f32 %v1403_v15, 0.0 }
 0x1bd   : > { %v1117_v17 = vpop.eup %1116  ;;  %1134 = vlog2.f32 %v757_v10  ;;  %v702_v21 = vand.u32 2147483647, %v1446_v12  ;;  %v742_v25 = vmul.f32 1.442695, %v716_v14  ;;  %v1451_v26 = vadd.f32 %v1068_v16, %v1392_v6 }
 0x1be   : > { %v1119_v22 = vpop.eup %1118  ;;  %v756_v23 = vadd.f32 1.0, %v1117_v17  ;;  %1136 = vpow2.f32 %v744_v13  ;;  %v660_v27 = vpop.f32.mrf.mxu1  ;;  %v719_v29 = vsub.f32 0.0, %v703_v19 }
 0x1bf   : > { %v759_v28 = vadd.f32 1.0, %v1119_v22  ;;  %v718_v31 = vsub.f32 0.0, %v702_v21  ;;  %v1454_v32 = vadd.f32 %v1392_v6, %v660_v27  ;;  %v705_v34 = vand.u32 2147483647, %v1451_v26 }
 0x1c0   : > { %1138 = vlog2.f32 %v756_v23  ;;  %v1121_v35 = vpop.eup %1120  ;;  %v748_v37 = vmul.f32 1.442695, %v719_v29  ;;  %v679_v22 = vmax.f32 %v1410_v24, 0.0 }
 0x1c1   : > { %1140 = vlog2.f32 %v759_v28  ;;  %v746_v38 = vmul.f32 1.442695, %v718_v31  ;;  %v758_v41 = vadd.f32 1.0, %v1121_v35  ;;  %v721_v42 = vsub.f32 0.0, %v705_v34 }
 0x1c2   : > { %v1123_v40 = vpop.eup %1122  ;;  %1142 = vpow2.f32 %v742_v25  ;;  %v704_v43 = vand.u32 2147483647, %v1454_v32 }
 0x1c3   : > { %v761_v44 = vadd.f32 1.0, %v1123_v40  ;;  %1144 = vpow2.f32 %v748_v37  ;;  %v752_v46 = vmul.f32 1.442695, %v721_v42  ;;  %v681_v40 = vmax.f32 %v1418_v33, 0.0 }
 0x1c4   : > { %v1125_v6 = vpop.eup %1124  ;;  %1146 = vlog2.f32 %v758_v41  ;;  %v720_v47 = vsub.f32 0.0, %v704_v43 }
 0x1c5   : > { %1148 = vlog2.f32 %v761_v44  ;;  %v760_v48 = vadd.f32 1.0, %v1125_v6 }
 0x1c6   : > { %v1127_v50 = vpop.eup %1126  ;;  %1150 = vpow2.f32 %v746_v38  ;;  %v750_v51 = vmul.f32 1.442695, %v720_v47 }
 0x1c7   : > { %v1129_v52 = vpop.eup %1128  ;;  %v773_v54 = vmul.f32 0.6931472, %v1127_v50  ;;  %1152 = vlog2.f32 %v760_v48 }
 0x1c8   : > { %v1131_v55 = vpop.eup %1130  ;;  %v763_v58 = vadd.f32 1.0, %v1129_v52  ;;  %1154 = vpow2.f32 %v752_v46  ;;  %v680_v46 = vmax.f32 %v1423_v39, 0.0 }
 0x1c9   : > { %v1133_v59 = vpop.eup %1132  ;;  %v803_v61 = vadd.f32 %v773_v54, %v675_v53  ;;  %v771_v63 = vmul.f32 0.6931472, %v1131_v55  ;;  %1156 = vpow2.f32 %v750_v51  ;;  %v683_v55 = vmax.f32 %v1427_v45, 0.0 }
 0x1ca   : > { %v1135_v0 = vpop.eup %1134  ;;  %1158 = vlog2.f32 %v763_v58  ;;  %v762_v1 = vadd.f32 1.0, %v1133_v59 }
 0x1cb   : > { %v1137_v2 = vpop.eup %1136  ;;  %v819_v3 = vsel %vm1462_vm5, %v803_v61, %v1395_v8  ;;  %v802_v4 = vadd.f32 %v771_v63, %v674_v62  ;;  %v777_v9 = vmul.f32 0.6931472, %v1135_v0  ;;  %v676_v8 = vmax.f32 %v1407_v20, 0.0 }
 0x1cc   : > { %835 = vst [vmem:[%s1471_s10 + $0x8] sm:$0xff] %v819_v3  ;;  %1160 = vlog2.f32 %v762_v1  ;;  %v765_v10 = vadd.f32 1.0, %v1137_v2  ;;  %v682_v62 = vmax.f32 %v1430_v49, 0.0  ;;  %v685_v2 = vmax.f32 %v1435_v56, 0.0 }
 0x1cd   : > { %v1139_v13 = vpop.eup %1138  ;;  %v818_v14 = vsel %vm1462_vm5, %v802_v4, %v1399_v11  ;;  %v805_v16 = vadd.f32 %v777_v9, %v677_v5 }
 0x1ce   : > { %v1141_v17 = vpop.eup %1140  ;;  %834 = vst [vmem:[%s1471_s10] sm:$0xff] %v818_v14  ;;  %v775_v18 = vmul.f32 0.6931472, %v1139_v13  ;;  %1162 = vlog2.f32 %v765_v10  ;;  %v687_v14 = vmax.f32 %v1443_v7, 0.0 }
 0x1cf   : > { %v1143_v19 = vpop.eup %1142  ;;  %v821_v21 = vsel %vm1462_vm5, %v805_v16, %v1403_v15  ;;  %v781_v23 = vmul.f32 0.6931472, %v1141_v17 }
 0x1d0   : > { %v1145_v25 = vpop.eup %1144  ;;  %837 = vst [vmem:[%s1471_s10 + $0x18] sm:$0xff] %v821_v21  ;;  %v804_v27 = vadd.f32 %v775_v18, %v676_v8  ;;  %v764_v11 = vadd.f32 1.0, %v1143_v19  ;;  %v686_v19 = vmax.f32 %v1446_v12, 0.0 }
 0x1d1   : > { %v1147_v28 = vpop.eup %1146  ;;  %v807_v29 = vadd.f32 %v781_v23, %v679_v22  ;;  %v767_v31 = vadd.f32 1.0, %v1145_v25 }
 0x1d2   : > { %v1149_v34 = vpop.eup %1148  ;;  %v820_v35 = vsel %vm1462_vm5, %v804_v27, %v1407_v20  ;;  %v779_v15 = vmul.f32 0.6931472, %v1147_v28  ;;  %1164 = vlog2.f32 %v764_v11  ;;  %v689_v27 = vmax.f32 %v1451_v26, 0.0 }
 0x1d3   : > { %v1151_v37 = vpop.eup %1150  ;;  %836 = vst [vmem:[%s1471_s10 + $0x10] sm:$0xff] %v820_v35  ;;  %v823_v38 = vsel %vm1462_vm5, %v807_v29, %v1410_v24  ;;  %v785_v41 = vmul.f32 0.6931472, %v1149_v34  ;;  %1166 = vlog2.f32 %v767_v31 }
 0x1d4   : > { %v1153_v42 = vpop.eup %1152  ;;  %839 = vst [vmem:[%s1471_s10 + $0x28] sm:$0xff] %v823_v38  ;;  %v806_v43 = vadd.f32 %v779_v15, %v678_v36  ;;  %v766_v20 = vadd.f32 1.0, %v1151_v37 }
 0x1d5   : > { %v1155_v44 = vpop.eup %1154  ;;  %v809_v6 = vadd.f32 %v785_v41, %v681_v40  ;;  %v783_v47 = vmul.f32 0.6931472, %v1153_v42 }
 0x1d6   : > { %v1157_v48 = vpop.eup %1156  ;;  %v822_v24 = vsel %vm1462_vm5, %v806_v43, %v1415_v30  ;;  %1168 = vlog2.f32 %v766_v20  ;;  %v769_v50 = vadd.f32 1.0, %v1155_v44 }
 0x1d7   : > { %v1159_v51 = vpop.eup %1158  ;;  %838 = vst [vmem:[%s1471_s10 + $0x20] sm:$0xff] %v822_v24  ;;  %v825_v52 = vsel %vm1462_vm5, %v809_v6, %v1418_v33  ;;  %v808_v53 = vadd.f32 %v783_v47, %v680_v46  ;;  %v768_v54 = vadd.f32 1.0, %v1157_v48 }
 0x1d8   : > { %841 = vst [vmem:[%s1471_s10 + $0x38] sm:$0xff] %v825_v52  ;;  %v789_v58 = vmul.f32 0.6931472, %v1159_v51  ;;  %1170 = vlog2.f32 %v769_v50 }
 0x1d9   : > { %v1161_v59 = vpop.eup %1160  ;;  %v824_v30 = vsel %vm1462_vm5, %v808_v53, %v1423_v39  ;;  %1172 = vlog2.f32 %v768_v54 }
 0x1da   : > { %840 = vst [vmem:[%s1471_s10 + $0x30] sm:$0xff] %v824_v30  ;;  %v811_v61 = vadd.f32 %v789_v58, %v683_v55  ;;  %v787_v33 = vmul.f32 0.6931472, %v1161_v59 }
 0x1db   : > { %v1163_v63 = vpop.eup %1162 }
 0x1dc   : > { %v827_v0 = vsel %vm1462_vm5, %v811_v61, %v1427_v45  ;;  %v810_v1 = vadd.f32 %v787_v33, %v682_v62  ;;  %v793_v3 = vmul.f32 0.6931472, %v1163_v63  ;;  %v684_v45 = vmax.f32 %v1438_v60, 0.0 }
 0x1dd   : > { %843 = vst [vmem:[%s1471_s10 + $0x48] sm:$0xff] %v827_v0 }
 0x1de   : > { %v826_v39 = vsel %vm1462_vm5, %v810_v1, %v1430_v49  ;;  %v813_v4 = vadd.f32 %v793_v3, %v685_v2 }
 0x1df   : > { %v1165_v5 = vpop.eup %1164  ;;  %842 = vst [vmem:[%s1471_s10 + $0x40] sm:$0xff] %v826_v39 }
 0x1e0   : > { %v1167_v9 = vpop.eup %1166  ;;  %v829_v10 = vsel %vm1462_vm5, %v813_v4, %v1435_v56  ;;  %v791_v13 = vmul.f32 0.6931472, %v1165_v5 }
 0x1e1   : > { %845 = vst [vmem:[%s1471_s10 + $0x58] sm:$0xff] %v829_v10  ;;  %v797_v16 = vmul.f32 0.6931472, %v1167_v9 }
 0x1e2   : > { %v812_v49 = vadd.f32 %v791_v13, %v684_v45 }
 0x1e3   : > { %v1169_v17 = vpop.eup %1168  ;;  %v815_v8 = vadd.f32 %v797_v16, %v687_v14 }
 0x1e4   : > { %v828_v18 = vsel %vm1462_vm5, %v812_v49, %v1438_v60  ;;  %v795_v56 = vmul.f32 0.6931472, %v1169_v17  ;;  %v688_v60 = vmax.f32 %v1454_v32, 0.0 }
 0x1e5   : > { %v1171_v21 = vpop.eup %1170  ;;  %844 = vst [vmem:[%s1471_s10 + $0x50] sm:$0xff] %v828_v18  ;;  %v831_v22 = vsel %vm1462_vm5, %v815_v8, %v1443_v7 }
 0x1e6   : > { %v1173_v23 = vpop.eup %1172  ;;  %847 = vst [vmem:[%s1471_s10 + $0x68] sm:$0xff] %v831_v22  ;;  %v814_v25 = vadd.f32 %v795_v56, %v686_v19  ;;  %v801_v11 = vmul.f32 0.6931472, %v1171_v21 }
 0x1e7   : > { %v799_v28 = vmul.f32 0.6931472, %v1173_v23 }
 0x1e8   : > { %v830_v29 = vsel %vm1462_vm5, %v814_v25, %v1446_v12  ;;  %v817_v7 = vadd.f32 %v801_v11, %v689_v27 }
 0x1e9   : > { %846 = vst [vmem:[%s1471_s10 + $0x60] sm:$0xff] %v830_v29  ;;  %v816_v31 = vadd.f32 %v799_v28, %v688_v60 }
 0x1ea   : > { %v833_v34 = vsel %vm1462_vm5, %v817_v7, %v1451_v26 }
 0x1eb   : > { %849 = vst [vmem:[%s1471_s10 + $0x78] sm:$0xff] %v833_v34  ;;  %v832_v12 = vsel %vm1462_vm5, %v816_v31, %v1454_v32 }
 0x1ec   : > { %848 = vst [vmem:[%s1471_s10 + $0x70] sm:$0xff] %v832_v12 }
 0x1ed   : > { %1187 = shalt.err (!%p1184_p3)
}
 0x1ee   : > { %s1188_s26 = scalar_lea.hbm %s1544_s15, 2048  ;;  %s1192_s7 = scalar_lea.hbm %s1603_s5, 4096 }
 0x1ef   : > { %p1189_p4 = scmp.ne.s32.totalorder %s1544_s15, %s1188_s26  ;;  %p1193_p9 = scmp.lt.s32.totalorder %s1544_s15, %s1603_s5 }
 0x1f0   : > { %p1194_p10 = scmp.lt.s32.totalorder %s1192_s7, %s1188_s26 }
 0x1f1   : > { %p1190_p7 = pnand %p1189_p4, %p1307_p5 }
 0x1f2   : > { %p1195_p11 = por %p1194_p10, %p1193_p9 }
 0x1f3   : > { %p1191_p8 = pneg %p1190_p7 }
 0x1f5   : > { %p1196_p12 = pnand %p1195_p11, %p1191_p8 }
 0x1f7   : > { %1199 = shalt.err (!%p1196_p12)
}
 0x1f8   : > { %s1237_s10 = smov 128   ;;  %s1238_s11 = smov 8  }
 0x1f9   : > { %1069 = dma.vmem_to_hbm [thread:$0]  (%p1307_p5), %s1546_s12, 2048, %s1544_s15, %s1558_s22, %s1237_s10, %s1237_s10, %s1238_s11  }
 0x1fa PF: > { %p1075_p13 = scmp.ge.s32.totalorder %s1234_s21, 2  ;;  %s879_s13 = sand.u32 1, %s1222_s18  }
 0x1fb   : > { %s880_s14 = scalar_lea.sflag [#allocation3], %s879_s13 }
 0x1fc   : > { %p1072_p0 = pnand %p1075_p13, %p1311_p6 }
 0x1fe   : > { %p1073_p1 = pneg %p1072_p0 }
 0x200   : > { %1217 = dma.done.wait (%p1073_p1), %s880_s14, 2048  }
 0x201   : > { %1219 = vsyncadd (%p1073_p1), %s880_s14, 4294965248  ;;  %p15_p2 = scmp.ge.s32.totalorder %s1294_s24, 4   ;;  %s1608_s18 = smov %s1226_s19 }
 0x202   : > { %s1609_s19 = smov %s1230_s20  ;;  %s1610_s20 = smov %s1305_s27 }
 0x203   : > { %s1611_s21 = smov %s1294_s24  ;;  %17 = sbr.rel (!%p15_p2) target bundleno = 3 (0x3), region = 75 }
 0x208   :  { %885 = vsyncpa [#allocation3], 1 }
 0x209   :  { %887 = vsyncpa [#allocation3 + $0x1], 1 }

</bundles_post_ra>
